<compile_context>
chip_gen: v7x
topology: tpu7x:2x2x1
jax: 0.10.0
libtpu: 0.0.40
codegen_flags: <defaults>
</compile_context>

<pallas_src>
import functools

import jax
import jax.numpy as jnp
from jax.experimental import pallas as pl
from jax.experimental.pallas import tpu as pltpu

_LANE = 128      # lane width  (last dim alignment)
_SUBLANE = 8     # sublane width (second-to-last dim alignment)


def _round_up(x, m):
    return (x + m - 1) // m * m


def _autoencoder_kernel(x_ref, w1_ref, b1_ref, w2_ref, b2_ref, out_ref):
    # Encoder: Linear(input_dim -> latent_dim) + ReLU   (f32 MXU accumulate)
    x = x_ref[...]
    h = jnp.dot(x, w1_ref[...], preferred_element_type=jnp.float32) + b1_ref[...]
    h = jnp.maximum(h, 0.0)
    # Decoder: Linear(latent_dim -> input_dim) + ReLU
    y = jnp.dot(h.astype(w2_ref.dtype), w2_ref[...],
                preferred_element_type=jnp.float32) + b2_ref[...]
    y = jnp.maximum(y, 0.0)
    out_ref[...] = y.astype(out_ref.dtype)


@functools.partial(jax.jit, static_argnames=("block_batch",))
def autoencoder_forward(x, w1, b1, w2, b2, *, block_batch=512):
    """x: (B, input_dim); w1: (input_dim, latent_dim); b1: (latent_dim,)
    w2: (latent_dim, input_dim); b2: (input_dim,)  ->  (B, input_dim)."""
    batch, input_dim = x.shape
    latent_dim = w1.shape[1]

    # Lane-dense feature padding (128) and sublane-aligned batch tile.
    din_p = _round_up(input_dim, _LANE)
    dlat_p = _round_up(latent_dim, _LANE)
    tm = min(block_batch, _round_up(batch, _SUBLANE))
    batch_p = _round_up(batch, tm)

    dt = x.dtype
    # Zero padding: padded weight rows/cols and bias lanes are exactly 0, so
    # padded lanes stay 0 through both ReLUs and never leak into real outputs.
    xp = jnp.zeros((batch_p, din_p), dt).at[:batch, :input_dim].set(x)
    w1p = jnp.zeros((din_p, dlat_p), w1.dtype).at[:input_dim, :latent_dim].set(w1)
    b1p = jnp.zeros((1, dlat_p), b1.dtype).at[0, :latent_dim].set(b1)
    w2p = jnp.zeros((dlat_p, din_p), w2.dtype).at[:latent_dim, :input_dim].set(w2)
    b2p = jnp.zeros((1, din_p), b2.dtype).at[0, :input_dim].set(b2)

    grid = (batch_p // tm,)

    # VMEM budget: double-buffered x/out tiles + resident weights/biases
    # + the (tm, dlat_p) intermediate.  Conservative (x2 headroom), capped
    # below v7x's 64 MiB physical VMEM.
    bytes_needed = (
        2 * 2 * tm * din_p * 4                 # x in + y out, double-buffered
        + 2 * (din_p * dlat_p + dlat_p * din_p) * 4   # w1, w2 (worst-case 2 bufs)
        + 2 * (dlat_p + din_p) * 4             # biases
        + tm * dlat_p * 4                      # intermediate h
    )
    vmem_limit = int(min(max(2 * bytes_needed, 16 << 20), 48 << 20))

    out = pl.pallas_call(
        _autoencoder_kernel,
        out_shape=jax.ShapeDtypeStruct((batch_p, din_p), dt),
        grid=grid,
        in_specs=[
            pl.BlockSpec((tm, din_p), lambda i: (i, 0)),       # x: tiled over batch
            pl.BlockSpec((din_p, dlat_p), lambda i: (0, 0)),   # w1: VMEM resident
            pl.BlockSpec((1, dlat_p), lambda i: (0, 0)),       # b1: VMEM resident
            pl.BlockSpec((dlat_p, din_p), lambda i: (0, 0)),   # w2: VMEM resident
            pl.BlockSpec((1, din_p), lambda i: (0, 0)),        # b2: VMEM resident
        ],
        out_specs=pl.BlockSpec((tm, din_p), lambda i: (i, 0)),
        compiler_params=pltpu.CompilerParams(
            dimension_semantics=("parallel",),   # megacore split on v7x
            vmem_limit_bytes=vmem_limit,
        ),
    )(xp, w1p, b1p, w2p, b2p)

    return out[:batch, :input_dim]


def init_params(key, input_dim, latent_dim, dtype=jnp.float32):
    """Mirrors nn.Linear's U(-1/sqrt(fan_in), 1/sqrt(fan_in)) init.
    Weights are stored already transposed: (in_features, out_features)."""
    k1, k2, k3, k4 = jax.random.split(key, 4)
    bound1 = 1.0 / jnp.sqrt(jnp.asarray(input_dim, dtype))
    bound2 = 1.0 / jnp.sqrt(jnp.asarray(latent_dim, dtype))
    w1 = jax.random.uniform(k1, (input_dim, latent_dim), dtype, -bound1, bound1)
    b1 = jax.random.uniform(k2, (latent_dim,), dtype, -bound1, bound1)
    w2 = jax.random.uniform(k3, (latent_dim, input_dim), dtype, -bound2, bound2)
    b2 = jax.random.uniform(k4, (input_dim,), dtype, -bound2, bound2)
    return w1, b1, w2, b2


def reference_forward(x, w1, b1, w2, b2):
    h = jnp.maximum(x @ w1 + b1, 0.0)
    return jnp.maximum(h @ w2 + b2, 0.0)


if __name__ == "__main__":
    key = jax.random.PRNGKey(0)
    input_dim, latent_dim = 64, 32
    kx1, kx2, kp = jax.random.split(key, 3)
    w1, b1, w2, b2 = init_params(kp, input_dim, latent_dim)

    # Small shape consistent with the module (single grid step).
    x_small = jax.random.normal(kx1, (8, input_dim), jnp.float32)
    out_small = jax.block_until_ready(autoencoder_forward(x_small, w1, b1, w2, b2))
    ref_small = reference_forward(x_small, w1, b1, w2, b2)
    assert out_small.shape == (8, input_dim), out_small.shape
    assert jnp.allclose(out_small, ref_small, atol=1e-5, rtol=1e-5), \
        "mismatch vs reference (small batch)"

    # Non-divisible, multi-tile batch to exercise the batch grid + padding path.
    x_big = jax.random.normal(kx2, (300, input_dim), jnp.float32)
    out_big = jax.block_until_ready(
        autoencoder_forward(x_big, w1, b1, w2, b2, block_batch=128))
    ref_big = reference_forward(x_big, w1, b1, w2, b2)
    assert out_big.shape == (300, input_dim), out_big.shape
    assert jnp.allclose(out_big, ref_big, atol=1e-5, rtol=1e-5), \
        "mismatch vs reference (multi-tile batch)"

    print("KERNEL_OK")
</pallas_src>

<mosaic_0001>
module attributes {stable_mosaic.version = 11 : i64} {
  func.func @_autoencoder_kernel(%arg0: i32, %arg1: memref<8x128xf32, #tpu.memory_space<vmem>>, %arg2: memref<128x128xf32, #tpu.memory_space<vmem>>, %arg3: memref<1x128xf32, #tpu.memory_space<vmem>>, %arg4: memref<128x128xf32, #tpu.memory_space<vmem>>, %arg5: memref<1x128xf32, #tpu.memory_space<vmem>>, %arg6: memref<8x128xf32, #tpu.memory_space<vmem>>) attributes {dimension_semantics = [#tpu.dimension_semantics<parallel>], iteration_bounds = array<i64: 1>, scalar_prefetch = 0 : i64, scratch_operands = 0 : i64, tpu.core_type = #tpu.core_type<tc>, window_params = [{transform_indices = @transform_0, window_bounds = array<i64: 8, 128>}, {pipeline_mode = #tpu.pipeline_mode<synchronous>, transform_indices = @transform_1, window_bounds = array<i64: 128, 128>}, {pipeline_mode = #tpu.pipeline_mode<synchronous>, transform_indices = @transform_2, window_bounds = array<i64: 1, 128>}, {pipeline_mode = #tpu.pipeline_mode<synchronous>, transform_indices = @transform_3, window_bounds = array<i64: 128, 128>}, {pipeline_mode = #tpu.pipeline_mode<synchronous>, transform_indices = @transform_4, window_bounds = array<i64: 1, 128>}, {transform_indices = @transform_5, window_bounds = array<i64: 8, 128>}]} {
    %c0 = arith.constant 0 : index
    %c0_0 = arith.constant 0 : index
    %0 = vector.load %arg1[%c0, %c0_0] : memref<8x128xf32, #tpu.memory_space<vmem>>, vector<8x128xf32>
    %c0_1 = arith.constant 0 : index
    %c0_2 = arith.constant 0 : index
    %1 = vector.load %arg2[%c0_1, %c0_2] : memref<128x128xf32, #tpu.memory_space<vmem>>, vector<128x128xf32>
    %cst = arith.constant dense<0.000000e+00> : vector<8x128xf32>
    %2 = tpu.matmul %0, %1, %cst {dimension_numbers = #tpu.dot_dimension_numbers<[1], [0], [0], [1], [0, 0, 1, 1], [], []>} : vector<8x128xf32>, vector<128x128xf32>, vector<8x128xf32> -> vector<8x128xf32>
    %c0_3 = arith.constant 0 : index
    %c0_4 = arith.constant 0 : index
    %3 = vector.load %arg3[%c0_3, %c0_4] : memref<1x128xf32, #tpu.memory_space<vmem>>, vector<1x128xf32>
    %4 = vector.broadcast %3 : vector<1x128xf32> to vector<8x128xf32>
    %5 = arith.addf %2, %4 : vector<8x128xf32>
    %cst_5 = arith.constant 0.000000e+00 : f32
    %6 = vector.broadcast %cst_5 : f32 to vector<8x128xf32>
    %7 = arith.maximumf %5, %6 : vector<8x128xf32>
    %c0_6 = arith.constant 0 : index
    %c0_7 = arith.constant 0 : index
    %8 = vector.load %arg4[%c0_6, %c0_7] : memref<128x128xf32, #tpu.memory_space<vmem>>, vector<128x128xf32>
    %cst_8 = arith.constant dense<0.000000e+00> : vector<8x128xf32>
    %9 = tpu.matmul %7, %8, %cst_8 {dimension_numbers = #tpu.dot_dimension_numbers<[1], [0], [0], [1], [0, 0, 1, 1], [], []>} : vector<8x128xf32>, vector<128x128xf32>, vector<8x128xf32> -> vector<8x128xf32>
    %c0_9 = arith.constant 0 : index
    %c0_10 = arith.constant 0 : index
    %10 = vector.load %arg5[%c0_9, %c0_10] : memref<1x128xf32, #tpu.memory_space<vmem>>, vector<1x128xf32>
    %11 = vector.broadcast %10 : vector<1x128xf32> to vector<8x128xf32>
    %12 = arith.addf %9, %11 : vector<8x128xf32>
    %cst_11 = arith.constant 0.000000e+00 : f32
    %13 = vector.broadcast %cst_11 : f32 to vector<8x128xf32>
    %14 = arith.maximumf %12, %13 : vector<8x128xf32>
    %c0_12 = arith.constant 0 : index
    %c0_13 = arith.constant 0 : index
    %15 = vector.load %arg6[%c0_12, %c0_13] : memref<8x128xf32, #tpu.memory_space<vmem>>, vector<8x128xf32>
    tpu.vector_store %arg6[%c0_12, %c0_13], %14 {strides = array<i32>} : memref<8x128xf32, #tpu.memory_space<vmem>>, vector<8x128xf32>,
    return
  }
  func.func @transform_0(%arg0: i32) -> (i32, i32) {
    %c0_i32 = arith.constant 0 : i32
    %c0_i32_0 = arith.constant 0 : i32
    return %arg0, %c0_i32 : i32, i32
  }
  func.func @transform_1(%arg0: i32) -> (i32, i32) {
    %c0_i32 = arith.constant 0 : i32
    %c0_i32_0 = arith.constant 0 : i32
    %c0_i32_1 = arith.constant 0 : i32
    return %c0_i32, %c0_i32_0 : i32, i32
  }
  func.func @transform_2(%arg0: i32) -> (i32, i32) {
    %c0_i32 = arith.constant 0 : i32
    %c0_i32_0 = arith.constant 0 : i32
    %c0_i32_1 = arith.constant 0 : i32
    return %c0_i32, %c0_i32_0 : i32, i32
  }
  func.func @transform_3(%arg0: i32) -> (i32, i32) {
    %c0_i32 = arith.constant 0 : i32
    %c0_i32_0 = arith.constant 0 : i32
    %c0_i32_1 = arith.constant 0 : i32
    return %c0_i32, %c0_i32_0 : i32, i32
  }
  func.func @transform_4(%arg0: i32) -> (i32, i32) {
    %c0_i32 = arith.constant 0 : i32
    %c0_i32_0 = arith.constant 0 : i32
    %c0_i32_1 = arith.constant 0 : i32
    return %c0_i32, %c0_i32_0 : i32, i32
  }
  func.func @transform_5(%arg0: i32) -> (i32, i32) {
    %c0_i32 = arith.constant 0 : i32
    %c0_i32_0 = arith.constant 0 : i32
    return %arg0, %c0_i32 : i32, i32
  }
}

</mosaic_0001>

<bundles_post_ra>
// kernel: autoencoder_forward.1
= control target key start
LH: loop header
LB: loop body
LE: loop exit
PB: predicated region body
PF: predicated region fallthrough
CT: control target
= control target key end

     0   :  { %v407_v3 = vmov 0.0|0.0   ;;  %vm408_vm0 = vmmov 0   ;;  %v409_v6 = vmov 0.0   ;;  %s574_s0 = inlined_call_operand.vmem [shape: f32[8,128], index: 0, kind: input, shape index: {}]   ;;  %s575_s1 = inlined_call_operand.vmem [shape: f32[128,128], index: 1, kind: input, shape index: {}]   ;;  %s576_s2 = inlined_call_operand.vmem [shape: f32[1,128], index: 2, kind: input, shape index: {}]   ;;  %s577_s3 = inlined_call_operand.vmem [shape: f32[128,128], index: 3, kind: input, shape index: {}]   ;;  %s578_s4 = inlined_call_operand.vmem [shape: f32[1,128], index: 4, kind: input, shape index: {}]   ;;  %s579_s5 = inlined_call_operand.hbm [shape: f32[8,128], index: 5, kind: output, shape index: {}]  }
   0x1   :  { %v22_v0 = vld [vmem:[%s575_s1] sm:$0xff]  ;;  %v23_v1 = vld [vmem:[%s575_s1 + $0x8] sm:$0xff]  ;;  %v24_v2 = vld [vmem:[%s575_s1 + $0x10] sm:$0xff]  ;;  %331 = vmatprep.subr.bf16.mxu0 %v407_v3  ;;  %293 = vmatprep.mubr.msk.f32.mxu0 %vm408_vm0, %v409_v6 }
   0x2   :  { %v332_v4 = vpack.c.bf16 %v23_v1, %v22_v0  ;;  %v25_v5 = vld [vmem:[%s575_s1 + $0x18] sm:$0xff]  ;;  %355 = vmatprep.subr.bf16.mxu1 %v407_v3  ;;  %328 = vmatprep.mubr.msk.f32.mxu1 %vm408_vm0, %v409_v6  ;;  %v26_v8 = vld [vmem:[%s575_s1 + $0x20] sm:$0xff]  ;;  %v27_v9 = vld [vmem:[%s575_s1 + $0x28] sm:$0xff] }
   0x3   :  { %v335_v7 = vpack.c.bf16 %v25_v5, %v24_v2  ;;  %v116_v10 = vld [vmem:[%s577_s3] sm:$0xff]  ;;  %v117_v11 = vld [vmem:[%s577_s3 + $0x8] sm:$0xff]  ;;  %v118_v12 = vld [vmem:[%s577_s3 + $0x10] sm:$0xff]  ;;  %v338_v14 = vpack.c.bf16 %v27_v9, %v26_v8 }
   0x4   :  { %333 = vmatpush3.bf16.msra.mxu0 %v332_v4  ;;  %v119_v13 = vld [vmem:[%s577_s3 + $0x18] sm:$0xff]  ;;  %v356_v15 = vpack.c.bf16 %v117_v11, %v116_v10  ;;  %v28_v16 = vld [vmem:[%s575_s1 + $0x30] sm:$0xff]  ;;  %v120_v19 = vld [vmem:[%s577_s3 + $0x20] sm:$0xff] }
   0x5   :  { %334 = vmatprep.subr.bf16.mxu0 %v407_v3  ;;  %v29_v17 = vld [vmem:[%s575_s1 + $0x38] sm:$0xff]  ;;  %v359_v18 = vpack.c.bf16 %v119_v13, %v118_v12  ;;  %v121_v20 = vld [vmem:[%s577_s3 + $0x28] sm:$0xff] }
   0x6   :  { %357 = vmatpush3.bf16.msra.mxu1 %v356_v15 }
   0x7   :  { %358 = vmatprep.subr.bf16.mxu1 %v407_v3 }
   0x8   :  { %336 = vmatpush3.bf16.msra.mxu0 %v335_v7 }
   0x9   :  { %337 = vmatprep.subr.bf16.mxu0 %v407_v3 }
   0xa   :  { %10 = vsyncpa [#allocation3], 0  ;;  %v341_v21 = vpack.c.bf16 %v29_v17, %v28_v16  ;;  %v30_v22 = vld [vmem:[%s575_s1 + $0x40] sm:$0xff]  ;;  %v31_v23 = vld [vmem:[%s575_s1 + $0x48] sm:$0xff]  ;;  %360 = vmatpush3.bf16.msra.mxu1 %v359_v18  ;;  %v362_v24 = vpack.c.bf16 %v121_v20, %v120_v19  ;;  %s410_s11 = smov [#allocation2]  }
   0xb   :  { %361 = vmatprep.subr.bf16.mxu1 %v407_v3  ;;  %v122_v25 = vld [vmem:[%s577_s3 + $0x30] sm:$0xff]  ;;  %v123_v26 = vld [vmem:[%s577_s3 + $0x38] sm:$0xff]  ;;  %v344_v27 = vpack.c.bf16 %v31_v23, %v30_v22  ;;  %v124_v31 = vld [vmem:[%s577_s3 + $0x40] sm:$0xff]  ;;  %s217_s12 = sshll.u32 %s410_s11, 4  ;;  %s218_s12 = int_to_ptr.vmem [resolvable:$true] %s217_s12 }
   0xc   :  { %339 = vmatpush3.bf16.msra.mxu0 %v338_v14  ;;  %v32_v28 = vld [vmem:[%s575_s1 + $0x50] sm:$0xff]  ;;  %v33_v29 = vld [vmem:[%s575_s1 + $0x58] sm:$0xff]  ;;  %v365_v30 = vpack.c.bf16 %v123_v26, %v122_v25  ;;  %v125_v32 = vld [vmem:[%s577_s3 + $0x48] sm:$0xff]  ;;  %p388_p1 = scmp.lt.s32.totalorder %s218_s12, %s218_s12 }
   0xd   :  { %340 = vmatprep.subr.bf16.mxu0 %v407_v3  ;;  %v347_v33 = vpack.c.bf16 %v33_v29, %v32_v28  ;;  %v34_v34 = vld [vmem:[%s575_s1 + $0x60] sm:$0xff]  ;;  %v35_v35 = vld [vmem:[%s575_s1 + $0x68] sm:$0xff]  ;;  %v368_v36 = vpack.c.bf16 %v125_v32, %v124_v31  ;;  %v126_v37 = vld [vmem:[%s577_s3 + $0x50] sm:$0xff] }
   0xe   :  { %363 = vmatpush3.bf16.msra.mxu1 %v362_v24  ;;  %v127_v38 = vld [vmem:[%s577_s3 + $0x58] sm:$0xff]  ;;  %v350_v39 = vpack.c.bf16 %v35_v35, %v34_v34  ;;  %v36_v40 = vld [vmem:[%s575_s1 + $0x70] sm:$0xff]  ;;  %v128_v43 = vld [vmem:[%s577_s3 + $0x60] sm:$0xff] }
   0xf   :  { %364 = vmatprep.subr.bf16.mxu1 %v407_v3  ;;  %v37_v41 = vld [vmem:[%s575_s1 + $0x78] sm:$0xff]  ;;  %v371_v42 = vpack.c.bf16 %v127_v38, %v126_v37  ;;  %v129_v44 = vld [vmem:[%s577_s3 + $0x68] sm:$0xff]  ;;  %v21_v47 = vld [vmem:[%s574_s0] sm:$0xff] }
  0x10   :  { %342 = vmatpush3.bf16.msra.mxu0 %v341_v21  ;;  %v353_v45 = vpack.c.bf16 %v37_v41, %v36_v40  ;;  %v374_v46 = vpack.c.bf16 %v129_v44, %v128_v43  ;;  %v130_v48 = vld [vmem:[%s577_s3 + $0x70] sm:$0xff]  ;;  %v131_v49 = vld [vmem:[%s577_s3 + $0x78] sm:$0xff]  ;;  %v225_v51 = vld [vmem:[%s576_s2] ss:$0 sm:$0xff]  ;;  %s383_s3 = scalar_lea.vmem %s218_s12, 128 }
  0x11   :  { %343 = vmatprep.subr.bf16.mxu0 %v407_v3  ;;  %v377_v50 = vpack.c.bf16 %v131_v49, %v130_v48  ;;  %v226_v56 = vld [vmem:[%s578_s4] ss:$0 sm:$0xff]  ;;  %p384_p0 = scmp.ne.s32.totalorder %s218_s12, %s383_s3  ;;  %p389_p2 = scmp.lt.s32.totalorder %s383_s3, %s383_s3 }
  0x12   :  { %366 = vmatpush3.bf16.msra.mxu1 %v365_v30 }
  0x13   :  { %367 = vmatprep.subr.bf16.mxu1 %v407_v3  ;;  %p390_p3 = por %p389_p2, %p388_p1 }
  0x14   :  { %345 = vmatpush3.bf16.msra.mxu0 %v344_v27 }
  0x15   :  { %346 = vmatprep.subr.bf16.mxu0 %v407_v3  ;;  %p391_p4 = pnand %p390_p3, %p384_p0 }
  0x16   :  { %369 = vmatpush3.bf16.msra.mxu1 %v368_v36 }
  0x17   :  { %370 = vmatprep.subr.bf16.mxu1 %v407_v3 }
  0x18   :  { %348 = vmatpush3.bf16.msra.mxu0 %v347_v33 }
  0x19   :  { %349 = vmatprep.subr.bf16.mxu0 %v407_v3 }
  0x1a   :  { %372 = vmatpush3.bf16.msra.mxu1 %v371_v42 }
  0x1b   :  { %373 = vmatprep.subr.bf16.mxu1 %v407_v3 }
  0x1c   :  { %351 = vmatpush3.bf16.msra.mxu0 %v350_v39 }
  0x1d   :  { %352 = vmatprep.subr.bf16.mxu0 %v407_v3 }
  0x1e   :  { %375 = vmatpush3.bf16.msra.mxu1 %v374_v46 }
  0x1f   :  { %376 = vmatprep.subr.bf16.mxu1 %v407_v3 }
  0x20   :  { %354 = vmatpush3.bf16.msra.mxu0 %v353_v45 }
  0x22   :  { %378 = vmatpush3.bf16.msra.mxu1 %v377_v50 }
  0x23   :  { %294 = vmatmul.mubr.f32.vlgmr.msra.gmra.mrb[0].mxu0 %v21_v47 }
  0xf6   :  { %v111_v52 = vpop.f32.mrb[0].mxu0 }
  0xf7   :  { %v112_v53 = vadd.f32 %v225_v51, %v111_v52  ;;  %v295_v54 = vpop.f32.mrb[1].mxu0 }
  0xf9   :  { %v115_v55 = vmax.f32 %v112_v53, 0.0 }
  0xfb   :  { %329 = vmatmul.mubr.f32.vlgmr.msra.gmra.mrb[0].mxu1 %v115_v55 }
 0x1ce   :  { %v205_v57 = vpop.f32.mrb[0].mxu1 }
 0x1cf   :  { %v206_v58 = vadd.f32 %v226_v56, %v205_v57  ;;  %v330_v59 = vpop.f32.mrb[1].mxu1 }
 0x1d1   :  { %v209_v60 = vmax.f32 %v206_v58, 0.0 }
 0x1d3   :  { %210 = vst [vmem:[#allocation2] sm:$0xff] %v209_v60 }
 0x1d4   :  { %394 = shalt.err (!%p391_p4)
}
 0x1d5   :  { %s395_s14 = scalar_lea.hbm %s579_s5, 128 }
 0x1d6   :  { %p396_p5 = scmp.ne.s32.totalorder %s579_s5, %s395_s14  ;;  %p399_p6 = scmp.lt.u32.totalorder %s395_s14, %s579_s5 }
 0x1d8   :  { %p401_p7 = pnand %p399_p6, %p396_p5 }
 0x1da   :  { %404 = shalt.err (!%p401_p7)
}
 0x1db   :  { %220 = dma.vmem_to_hbm [thread:$0]  %s218_s12, 128, %s579_s5, [#allocation3]  }
 0x1dc   :  { %405 = dma.done.wait [#allocation3], 128  }
 0x1dd   :  { %406 = vsyncadd [#allocation3], 4294967168 }
 0x1de   :  { %224 = vsyncpa [#allocation3], 1 }

</bundles_post_ra>
